<compile_context>
chip_gen: v7x
topology: tpu7x:2x2x1
jax: 0.10.0
libtpu: 0.0.40
codegen_flags: <defaults>
</compile_context>

<pallas_src>
import math

import jax
import jax.numpy as jnp
from jax.experimental import pallas as pl
from jax.experimental.pallas import tpu as pltpu


def _round_up(x, m):
    return ((x + m - 1) // m) * m


def _padded_bytes(shape, dtype):
    """Rough VMEM footprint of one buffer of `shape` ((8,128)-tile padded)."""
    s = list(shape)
    if len(s) >= 2:
        s[-1] = _round_up(s[-1], 128)
        s[-2] = _round_up(s[-2], 8)
    elif len(s) == 1:
        s[-1] = _round_up(s[-1], 128)
    return math.prod(s) * jnp.dtype(dtype).itemsize


def _decoder_kernel(use_tgt_ref,                    # SMEM (T-1,) int32 (scalar prefetch)
                    tgt_emb_ref,                    # (1, B, Wd)  f32   per-step stream
                    emb_ref,                        # (VEp, Wd)   bf16  resident
                    gi_c_ref,                       # (B, 3H)     f32   resident (ctx@Wih_c+b_ih)
                    wih_w_ref,                      # (Wd, 3H)    bf16  resident
                    whh_ref,                        # (H, 3H)     bf16  resident
                    bhh_ref,                        # (1, 3H)     f32   resident
                    wo_ref,                         # (H, TILE_V) bf16  resident / streamed
                    bo_ref,                         # (1, TILE_V) f32
                    h0_ref,                         # (B, H)      f32   resident
                    logits_ref,                     # out (1, B, TILE_V) f32
                    pred_ref,                       # out (1, B, 1)      int32
                    h_scr, max_scr, arg_scr):       # VMEM scratch
    t = pl.program_id(0)            # decode step (sequential: hidden recurrence)
    v = pl.program_id(1)            # vocab tile  (sequential: running argmax)
    nv = pl.num_programs(1)
    B, H = h0_ref.shape
    tile_v = wo_ref.shape[1]

    # ---- one-time init: hidden <- encoder last hidden, feedback token <- <BOS>=1 ----
    @pl.when(jnp.logical_and(t == 0, v == 0))
    def _():
        h_scr[...] = h0_ref[...]
        arg_scr[...] = jnp.ones(arg_scr.shape, jnp.int32)

    # ---- per-step recurrent update (runs only on the first vocab tile) ----
    @pl.when(v == 0)
    def _():
        # input word: teacher forcing (target embedding) vs. embedding of the previous
        # step's argmax.  The feedback gather is a one-hot matmul against the
        # VMEM-resident bf16 embedding table (no dynamic gather needed).
        # TODO(synk): for very large vocabularies replace this with a manual per-row
        # DMA gather from HBM (memory_space=pl.ANY) so the table need not be resident.
        tf_flag = (use_tgt_ref[t] > 0).astype(jnp.float32)
        tgt_word = tgt_emb_ref[0]                                        # (B, Wd) f32
        ve = emb_ref.shape[0]
        onehot = jnp.where(
            jax.lax.broadcasted_iota(jnp.int32, (B, ve), 1) == arg_scr[...],
            1.0, 0.0).astype(jnp.bfloat16)                               # (B, VEp)
        fb_word = jnp.dot(onehot, emb_ref[...],
                          preferred_element_type=jnp.float32)            # (B, Wd) f32
        word = tf_flag * tgt_word + (1.0 - tf_flag) * fb_word

        # GRU cell (PyTorch gate order r, z, n).  The context half of the input matmul
        # is time-invariant and pre-folded into gi_c on the host.
        h = h_scr[...]                                                   # (B, H) f32
        gi = (jnp.dot(word.astype(jnp.bfloat16), wih_w_ref[...],
                      preferred_element_type=jnp.float32) + gi_c_ref[...])
        gh = (jnp.dot(h.astype(jnp.bfloat16), whh_ref[...],
                      preferred_element_type=jnp.float32) + bhh_ref[...])
        r = jax.nn.sigmoid(gi[:, :H] + gh[:, :H])
        z = jax.nn.sigmoid(gi[:, H:2 * H] + gh[:, H:2 * H])
        n = jnp.tanh(gi[:, 2 * H:] + r * gh[:, 2 * H:])
        h_scr[...] = (1.0 - z) * n + z * h

        # reset running max for this step's vocab argmax
        max_scr[...] = jnp.full(max_scr.shape, -jnp.inf, jnp.float32)

    # ---- lane-dense vocab projection tile + running argmax (greedy feedback) ----
    h_new = h_scr[...]
    logits = (jnp.dot(h_new.astype(jnp.bfloat16), wo_ref[...],
                      preferred_element_type=jnp.float32) + bo_ref[...])  # (B, TILE_V)
    logits_ref[0] = logits

    ids = jax.lax.broadcasted_iota(jnp.int32, logits.shape, 1) + v * tile_v
    tile_max = jnp.max(logits, axis=-1, keepdims=True)                    # (B, 1)
    tile_arg = jnp.min(jnp.where(logits == tile_max, ids, jnp.int32(2 ** 30)),
                       axis=-1, keepdims=True)                            # (B, 1)
    better = tile_max > max_scr[...]
    arg_scr[...] = jnp.where(better, tile_arg, arg_scr[...])
    max_scr[...] = jnp.where(better, tile_max, max_scr[...])

    # ---- emit this step's greedy prediction once the whole vocab has been scanned ----
    @pl.when(v == nv - 1)
    def _():
        pred_ref[0] = arg_scr[...]


def init_params(key, hidden, word_dim, vocab_size, output_size):
    """Deterministic parameter init (shapes follow the PyTorch module, pre-transposed)."""
    ks = jax.random.split(key, 12)
    H, Wd = hidden, word_dim
    s = 0.05

    def u(k, shape):
        return jax.random.uniform(k, shape, jnp.float32, -s, s)

    emb = u(ks[0], (vocab_size + 4, Wd))
    params = {
        # attention (stored pre-transposed: (in, out))
        "w1_t": u(ks[1], (2 * H, 3 * H)), "b1": u(ks[2], (1, 3 * H)),
        "w4_t": u(ks[3], (3 * H, H)),     "b4": u(ks[4], (1, H)),
        "wt_t": u(ks[5], (H, 1)),
        # GRU (input = [word_emb, context])
        "wih_t": u(ks[6], (Wd + H, 3 * H)), "bih": u(ks[7], (1, 3 * H)),
        "whh_t": u(ks[8], (H, 3 * H)),      "bhh": u(ks[9], (1, 3 * H)),
        # final output linear
        "wo_t": u(ks[10], (H, output_size)), "bo": u(ks[11], (1, output_size)),
    }
    return emb, params


def decoder_rnn_forward(encoder_last_hidden_state, encoder_output, targets,
                        emb, params, tr_steps, tf_key):
    """Mirrors decoderRNN.forward (mode='train'); the whole step loop is one pallas_call."""
    B, S, H = encoder_output.shape
    enc = encoder_output.astype(jnp.float32)
    hidden0 = encoder_last_hidden_state.reshape(B, H).astype(jnp.float32)
    T = targets.shape[1]
    n_steps = T - 1
    Wd = emb.shape[1]
    V = params["wo_t"].shape[1]

    # teacher-forcing mask, precomputed device-side (no per-step host sync):
    # reference uses the target when random.uniform(0.05, 0.995) > expit(tr_steps/20 + 0.85)
    threshold = jax.nn.sigmoid(jnp.asarray(tr_steps, jnp.float32) / 20.0 + 0.85)
    draws = jax.random.uniform(tf_key, (n_steps,), jnp.float32, 0.05, 0.995)
    use_tgt = (draws > threshold).astype(jnp.int32)

    # teacher-forced word embeddings, time-major so each step streams one (B, Wd) block
    tgt_emb = jnp.transpose(emb[targets[:, :n_steps]], (1, 0, 2)).astype(jnp.float32)

    # ---- attention hoisted out of the kernel --------------------------------------
    # linear1 -> linear4 -> to_weight has no activation, so
    #   score_s = [enc_s ; h] @ (W1^T W4^T wt^T) + const
    # The hidden-state term and all bias terms are identical for every encoder
    # position, so they cancel in the softmax: attention weights and the context are
    # time-invariant.  Compute ctx once and fold its GRU contribution into gi_c.
    v_full = params["w1_t"] @ params["w4_t"] @ params["wt_t"]            # (2H, 1)
    v_enc = v_full[:H, 0]                                                # (H,)
    scores = jnp.einsum("bsh,h->bs", enc, v_enc)                         # (B, S)
    attn = jax.nn.softmax(scores, axis=-1)
    ctx = jnp.einsum("bs,bsh->bh", attn, enc)                            # (B, H)

    wih_w = params["wih_t"][:Wd]                                         # (Wd, 3H)
    wih_c = params["wih_t"][Wd:]                                         # (H, 3H)
    gi_c = ctx @ wih_c + params["bih"]                                   # (B, 3H) f32

    # lane-dense vocab tiling; wo stays fully resident when the bf16 matrix fits a
    # modest VMEM budget (DMA'd once), otherwise streamed in 2048-wide tiles.
    v_pad128 = _round_up(V, 128)
    if H * v_pad128 * 2 <= 24 * 1024 * 1024:
        tile_v = v_pad128
    else:
        tile_v = 2048
    v_pad = _round_up(V, tile_v)
    nv = v_pad // tile_v
    wo_pad = jnp.pad(params["wo_t"], ((0, 0), (0, v_pad - V))).astype(jnp.bfloat16)
    # padded bias columns get -1e30 (kept f32) so they never win the running argmax
    bo_pad = jnp.pad(params["bo"], ((0, 0), (0, v_pad - V)), constant_values=-1e30)

    # embedding table (bf16, row-padded) for the one-hot greedy-feedback gather
    ve = emb.shape[0]
    ve_pad = _round_up(ve, 128)
    emb_pad = jnp.pad(emb, ((0, ve_pad - ve), (0, 0))).astype(jnp.bfloat16)

    wih_w_b = wih_w.astype(jnp.bfloat16)
    whh_b = params["whh_t"].astype(jnp.bfloat16)
    bhh = params["bhh"]

    in_blocks = [
        ((1, B, Wd),   jnp.float32,  lambda t, v, ut: (t, 0, 0)),   # tgt_emb (per step)
        ((ve_pad, Wd), jnp.bfloat16, lambda t, v, ut: (0, 0)),      # embedding table
        ((B, 3 * H),   jnp.float32,  lambda t, v, ut: (0, 0)),      # gi_c (ctx fold)
        ((Wd, 3 * H),  jnp.bfloat16, lambda t, v, ut: (0, 0)),      # W_ih (word rows)
        ((H, 3 * H),   jnp.bfloat16, lambda t, v, ut: (0, 0)),      # W_hh
        ((1, 3 * H),   jnp.float32,  lambda t, v, ut: (0, 0)),      # b_hh
        ((H, tile_v),  jnp.bfloat16, lambda t, v, ut: (0, v)),      # W_out tile
        ((1, tile_v),  jnp.float32,  lambda t, v, ut: (0, v)),      # b_out tile
        ((B, H),       jnp.float32,  lambda t, v, ut: (0, 0)),      # initial hidden
    ]
    out_blocks = [((1, B, tile_v), jnp.float32), ((1, B, 1), jnp.int32)]

    # VMEM budget: double-buffered blocks + scratch, clamped to chip capacity.
    needed = 2 * sum(_padded_bytes(s, d) for s, d, _ in in_blocks)
    needed += 2 * sum(_padded_bytes(s, d) for s, d in out_blocks)
    needed += _padded_bytes((B, H), jnp.float32) + 2 * _padded_bytes((B, 1), jnp.float32)
    needed += 2 * 1024 * 1024
    try:
        cap = int(pltpu.get_tpu_info().vmem_capacity_bytes)
    except Exception:
        cap = 64 * 1024 * 1024
    vmem_limit = int(min(max(needed, 32 * 1024 * 1024),
                         max(cap - 8 * 1024 * 1024, 16 * 1024 * 1024)))

    grid_spec = pltpu.PrefetchScalarGridSpec(
        num_scalar_prefetch=1,
        grid=(n_steps, nv),
        in_specs=[pl.BlockSpec(shape, idx) for shape, _, idx in in_blocks],
        out_specs=[
            pl.BlockSpec((1, B, tile_v), lambda t, v, ut: (t, 0, v)),   # logits
            pl.BlockSpec((1, B, 1), lambda t, v, ut: (t, 0, 0)),        # predictions
        ],
        scratch_shapes=[
            pltpu.VMEM((B, H), jnp.float32),   # recurrent hidden state
            pltpu.VMEM((B, 1), jnp.float32),   # running max logit (across vocab tiles)
            pltpu.VMEM((B, 1), jnp.int32),     # running argmax -> next feedback token
        ],
    )

    logits_all, preds = pl.pallas_call(
        _decoder_kernel,
        out_shape=(jax.ShapeDtypeStruct((n_steps, B, v_pad), jnp.float32),
                   jax.ShapeDtypeStruct((n_steps, B, 1), jnp.int32)),
        grid_spec=grid_spec,
        compiler_params=pltpu.CompilerParams(
            dimension_semantics=("arbitrary", "arbitrary"),
            vmem_limit_bytes=vmem_limit),
    )(use_tgt, tgt_emb, emb_pad, gi_c, wih_w_b, whh_b, bhh, wo_pad, bo_pad, hidden0)

    # Interface parity with the PyTorch module: (B, T-1, V) logits + (B, T-1) argmax.
    # (Downstream code that can consume time-major logits should skip this transpose;
    #  the argmax is taken from the kernel's prediction output, never recomputed.)
    seq_logProb = jnp.transpose(logits_all, (1, 0, 2))[:, :, :V]
    seq_predictions = jnp.transpose(preds[:, :, 0], (1, 0))
    return seq_logProb, seq_predictions


if __name__ == "__main__":
    # small, module-consistent shapes
    B, S, H = 2, 8, 32          # batch, encoder seq len, hidden size
    Wd = 64                     # word embedding dim
    vocab_size = 50
    output_size = vocab_size
    T = 6                       # target caption length

    key = jax.random.PRNGKey(0)
    k_param, k_enc, k_hid, k_tgt, k_tf = jax.random.split(key, 5)

    emb, params = init_params(k_param, H, Wd, vocab_size, output_size)

    encoder_output = jax.random.normal(k_enc, (B, S, H), jnp.float32)
    encoder_last_hidden_state = jax.random.normal(k_hid, (1, B, H), jnp.float32)
    targets = jax.random.randint(k_tgt, (B, T), 0, vocab_size + 4, jnp.int32)

    forward = jax.jit(decoder_rnn_forward)
    seq_logProb, seq_predictions = forward(
        encoder_last_hidden_state, encoder_output, targets,
        emb, params, 10, k_tf)

    jax.block_until_ready(seq_logProb)
    jax.block_until_ready(seq_predictions)
    assert seq_logProb.shape == (B, T - 1, output_size)
    assert seq_predictions.shape == (B, T - 1)
    assert bool(jnp.all(jnp.isfinite(seq_logProb)))
    print("KERNEL_OK")
</pallas_src>

<mosaic_0001>
module attributes {stable_mosaic.version = 11 : i64} {
  func.func @_decoder_kernel(%arg0: i32, %arg1: i32, %arg2: memref<5xi32, #tpu.memory_space<smem>>, %arg3: memref<1x2x64xf32, #tpu.memory_space<vmem>>, %arg4: memref<128x64xbf16, #tpu.memory_space<vmem>>, %arg5: memref<2x96xf32, #tpu.memory_space<vmem>>, %arg6: memref<64x96xbf16, #tpu.memory_space<vmem>>, %arg7: memref<32x96xbf16, #tpu.memory_space<vmem>>, %arg8: memref<1x96xf32, #tpu.memory_space<vmem>>, %arg9: memref<32x128xbf16, #tpu.memory_space<vmem>>, %arg10: memref<1x128xf32, #tpu.memory_space<vmem>>, %arg11: memref<2x32xf32, #tpu.memory_space<vmem>>, %arg12: memref<1x2x128xf32, #tpu.memory_space<vmem>>, %arg13: memref<1x2x1xi32, #tpu.memory_space<vmem>>, %arg14: memref<2x32xf32, #tpu.memory_space<vmem>>, %arg15: memref<2x1xf32, #tpu.memory_space<vmem>>, %arg16: memref<2x1xi32, #tpu.memory_space<vmem>>) attributes {dimension_semantics = [#tpu.dimension_semantics<arbitrary>, #tpu.dimension_semantics<arbitrary>], iteration_bounds = array<i64: 5, 1>, scalar_prefetch = 1 : i64, scratch_operands = 3 : i64, tpu.core_type = #tpu.core_type<tc>, window_params = [{transform_indices = @transform_0, window_bounds = array<i64: 1, 2, 64>}, {pipeline_mode = #tpu.pipeline_mode<synchronous>, transform_indices = @transform_1, window_bounds = array<i64: 128, 64>}, {pipeline_mode = #tpu.pipeline_mode<synchronous>, transform_indices = @transform_2, window_bounds = array<i64: 2, 96>}, {pipeline_mode = #tpu.pipeline_mode<synchronous>, transform_indices = @transform_3, window_bounds = array<i64: 64, 96>}, {pipeline_mode = #tpu.pipeline_mode<synchronous>, transform_indices = @transform_4, window_bounds = array<i64: 32, 96>}, {pipeline_mode = #tpu.pipeline_mode<synchronous>, transform_indices = @transform_5, window_bounds = array<i64: 1, 96>}, {transform_indices = @transform_6, window_bounds = array<i64: 32, 128>}, {transform_indices = @transform_7, window_bounds = array<i64: 1, 128>}, {pipeline_mode = #tpu.pipeline_mode<synchronous>, transform_indices = @transform_8, window_bounds = array<i64: 2, 32>}, {transform_indices = @transform_9, window_bounds = array<i64: 1, 2, 128>}, {transform_indices = @transform_10, window_bounds = array<i64: 1, 2, 1>}]} {
    %c0_i32 = arith.constant 0 : i32
    %0 = arith.cmpi eq, %arg0, %c0_i32 : i32
    %c0_i32_0 = arith.constant 0 : i32
    %1 = arith.cmpi eq, %arg1, %c0_i32_0 : i32
    %2 = arith.andi %0, %1 : i1
    %3 = arith.extui %2 : i1 to i32
    %c0_i32_1 = arith.constant 0 : i32
    %4 = arith.cmpi ne, %3, %c0_i32_1 : i32
    scf.if %4 {
      %c0_26 = arith.constant 0 : index
      %c0_27 = arith.constant 0 : index
      %41 = vector.load %arg11[%c0_26, %c0_27] : memref<2x32xf32, #tpu.memory_space<vmem>>, vector<2x32xf32>
      %c0_28 = arith.constant 0 : index
      %c0_29 = arith.constant 0 : index
      %42 = vector.load %arg14[%c0_28, %c0_29] : memref<2x32xf32, #tpu.memory_space<vmem>>, vector<2x32xf32>
      tpu.vector_store %arg14[%c0_28, %c0_29], %41 {strides = array<i32>} : memref<2x32xf32, #tpu.memory_space<vmem>>, vector<2x32xf32>,
      %c1_i32 = arith.constant 1 : i32
      %43 = vector.broadcast %c1_i32 : i32 to vector<2x1xi32>
      %c0_30 = arith.constant 0 : index
      %c0_31 = arith.constant 0 : index
      %44 = vector.load %arg16[%c0_30, %c0_31] : memref<2x1xi32, #tpu.memory_space<vmem>>, vector<2x1xi32>
      tpu.vector_store %arg16[%c0_30, %c0_31], %43 {strides = array<i32>} : memref<2x1xi32, #tpu.memory_space<vmem>>, vector<2x1xi32>,
    } else {
    }
    %c0_i32_2 = arith.constant 0 : i32
    %5 = arith.cmpi eq, %arg1, %c0_i32_2 : i32
    %6 = arith.extui %5 : i1 to i32
    %c0_i32_3 = arith.constant 0 : i32
    %7 = arith.cmpi ne, %6, %c0_i32_3 : i32
    scf.if %7 {
      %41 = arith.index_cast %arg0 : i32 to index
      %42 = memref.load %arg2[%41] : memref<5xi32, #tpu.memory_space<smem>>
      %c0_i32_26 = arith.constant 0 : i32
      %43 = arith.cmpi sgt, %42, %c0_i32_26 : i32
      %44 = arith.extui %43 : i1 to i32
      %45 = arith.sitofp %44 : i32 to f32
      %c0_27 = arith.constant 0 : index
      %c0_28 = arith.constant 0 : index
      %c0_29 = arith.constant 0 : index
      %46 = vector.load %arg3[%c0_27, %c0_28, %c0_29] : memref<1x2x64xf32, #tpu.memory_space<vmem>>, vector<1x2x64xf32>
      %47 = vector.shape_cast %46 : vector<1x2x64xf32> to vector<2x64xf32>
      %48 = tpu.iota {dimensions = array<i32: 1>} : vector<2x128xi32>
      %c0_30 = arith.constant 0 : index
      %c0_31 = arith.constant 0 : index
      %49 = vector.load %arg16[%c0_30, %c0_31] : memref<2x1xi32, #tpu.memory_space<vmem>>, vector<2x1xi32>
      %50 = vector.broadcast %49 : vector<2x1xi32> to vector<2x128xi32>
      %51 = arith.cmpi eq, %48, %50 : vector<2x128xi32>
      %cst_32 = arith.constant 1.000000e+00 : f32
      %cst_33 = arith.constant 0.000000e+00 : f32
      %52 = vector.broadcast %cst_32 : f32 to vector<2x128xf32>
      %53 = vector.broadcast %cst_33 : f32 to vector<2x128xf32>
      %54 = arith.select %51, %52, %53 : vector<2x128xi1>, vector<2x128xf32>
      %55 = arith.truncf %54 : vector<2x128xf32> to vector<2x128xbf16>
      %c0_34 = arith.constant 0 : index
      %c0_35 = arith.constant 0 : index
      %56 = vector.load %arg4[%c0_34, %c0_35] : memref<128x64xbf16, #tpu.memory_space<vmem>>, vector<128x64xbf16>
      %cst_36 = arith.constant dense<0.000000e+00> : vector<2x64xf32>
      %57 = tpu.matmul %55, %56, %cst_36 {dimension_numbers = #tpu.dot_dimension_numbers<[1], [0], [0], [1], [0, 0, 1, 1], [], []>} : vector<2x128xbf16>, vector<128x64xbf16>, vector<2x64xf32> -> vector<2x64xf32>
      %58 = vector.broadcast %45 : f32 to vector<2x64xf32>
      %59 = arith.mulf %58, %47 : vector<2x64xf32>
      %cst_37 = arith.constant 1.000000e+00 : f32
      %60 = arith.subf %cst_37, %45 : f32
      %61 = vector.broadcast %60 : f32 to vector<2x64xf32>
      %62 = arith.mulf %61, %57 : vector<2x64xf32>
      %63 = arith.addf %59, %62 : vector<2x64xf32>
      %c0_38 = arith.constant 0 : index
      %c0_39 = arith.constant 0 : index
      %64 = vector.load %arg14[%c0_38, %c0_39] : memref<2x32xf32, #tpu.memory_space<vmem>>, vector<2x32xf32>
      %65 = arith.truncf %63 : vector<2x64xf32> to vector<2x64xbf16>
      %c0_40 = arith.constant 0 : index
      %c0_41 = arith.constant 0 : index
      %66 = vector.load %arg6[%c0_40, %c0_41] : memref<64x96xbf16, #tpu.memory_space<vmem>>, vector<64x96xbf16>
      %cst_42 = arith.constant dense<0.000000e+00> : vector<2x96xf32>
      %67 = tpu.matmul %65, %66, %cst_42 {dimension_numbers = #tpu.dot_dimension_numbers<[1], [0], [0], [1], [0, 0, 1, 1], [], []>} : vector<2x64xbf16>, vector<64x96xbf16>, vector<2x96xf32> -> vector<2x96xf32>
      %c0_43 = arith.constant 0 : index
      %c0_44 = arith.constant 0 : index
      %68 = vector.load %arg5[%c0_43, %c0_44] : memref<2x96xf32, #tpu.memory_space<vmem>>, vector<2x96xf32>
      %69 = arith.addf %67, %68 : vector<2x96xf32>
      %70 = arith.truncf %64 : vector<2x32xf32> to vector<2x32xbf16>
      %c0_45 = arith.constant 0 : index
      %c0_46 = arith.constant 0 : index
      %71 = vector.load %arg7[%c0_45, %c0_46] : memref<32x96xbf16, #tpu.memory_space<vmem>>, vector<32x96xbf16>
      %cst_47 = arith.constant dense<0.000000e+00> : vector<2x96xf32>
      %72 = tpu.matmul %70, %71, %cst_47 {dimension_numbers = #tpu.dot_dimension_numbers<[1], [0], [0], [1], [0, 0, 1, 1], [], []>} : vector<2x32xbf16>, vector<32x96xbf16>, vector<2x96xf32> -> vector<2x96xf32>
      %c0_48 = arith.constant 0 : index
      %c0_49 = arith.constant 0 : index
      %73 = vector.load %arg8[%c0_48, %c0_49] : memref<1x96xf32, #tpu.memory_space<vmem>>, vector<1x96xf32>
      %74 = vector.broadcast %73 : vector<1x96xf32> to vector<2x96xf32>
      %75 = arith.addf %72, %74 : vector<2x96xf32>
      %76 = vector.extract_strided_slice %69 {offsets = [0, 0], sizes = [2, 32], strides = [1, 1]} : vector<2x96xf32> to vector<2x32xf32>
      %77 = vector.extract_strided_slice %75 {offsets = [0, 0], sizes = [2, 32], strides = [1, 1]} : vector<2x96xf32> to vector<2x32xf32>
      %78 = arith.addf %76, %77 : vector<2x32xf32>
      %79 = arith.negf %78 : vector<2x32xf32>
      %80 = math.exp %79 : vector<2x32xf32>
      %cst_50 = arith.constant 1.000000e+00 : f32
      %81 = vector.broadcast %cst_50 : f32 to vector<2x32xf32>
      %82 = arith.addf %81, %80 : vector<2x32xf32>
      %83 = arith.divf %81, %82 : vector<2x32xf32>
      %84 = vector.extract_strided_slice %69 {offsets = [0, 32], sizes = [2, 32], strides = [1, 1]} : vector<2x96xf32> to vector<2x32xf32>
      %85 = vector.extract_strided_slice %75 {offsets = [0, 32], sizes = [2, 32], strides = [1, 1]} : vector<2x96xf32> to vector<2x32xf32>
      %86 = arith.addf %84, %85 : vector<2x32xf32>
      %87 = arith.negf %86 : vector<2x32xf32>
      %88 = math.exp %87 : vector<2x32xf32>
      %cst_51 = arith.constant 1.000000e+00 : f32
      %89 = vector.broadcast %cst_51 : f32 to vector<2x32xf32>
      %90 = arith.addf %89, %88 : vector<2x32xf32>
      %91 = arith.divf %89, %90 : vector<2x32xf32>
      %92 = vector.extract_strided_slice %69 {offsets = [0, 64], sizes = [2, 32], strides = [1, 1]} : vector<2x96xf32> to vector<2x32xf32>
      %93 = vector.extract_strided_slice %75 {offsets = [0, 64], sizes = [2, 32], strides = [1, 1]} : vector<2x96xf32> to vector<2x32xf32>
      %94 = arith.mulf %83, %93 : vector<2x32xf32>
      %95 = arith.addf %92, %94 : vector<2x32xf32>
      %96 = math.tanh %95 : vector<2x32xf32>
      %cst_52 = arith.constant 1.000000e+00 : f32
      %97 = vector.broadcast %cst_52 : f32 to vector<2x32xf32>
      %98 = arith.subf %97, %91 : vector<2x32xf32>
      %99 = arith.mulf %98, %96 : vector<2x32xf32>
      %100 = arith.mulf %91, %64 : vector<2x32xf32>
      %101 = arith.addf %99, %100 : vector<2x32xf32>
      %c0_53 = arith.constant 0 : index
      %c0_54 = arith.constant 0 : index
      %102 = vector.load %arg14[%c0_53, %c0_54] : memref<2x32xf32, #tpu.memory_space<vmem>>, vector<2x32xf32>
      tpu.vector_store %arg14[%c0_53, %c0_54], %101 {strides = array<i32>} : memref<2x32xf32, #tpu.memory_space<vmem>>, vector<2x32xf32>,
      %cst_55 = arith.constant 0xFF800000 : f32
      %103 = vector.broadcast %cst_55 : f32 to vector<2x1xf32>
      %c0_56 = arith.constant 0 : index
      %c0_57 = arith.constant 0 : index
      %104 = vector.load %arg15[%c0_56, %c0_57] : memref<2x1xf32, #tpu.memory_space<vmem>>, vector<2x1xf32>
      tpu.vector_store %arg15[%c0_56, %c0_57], %103 {strides = array<i32>} : memref<2x1xf32, #tpu.memory_space<vmem>>, vector<2x1xf32>,
    } else {
    }
    %c0 = arith.constant 0 : index
    %c0_4 = arith.constant 0 : index
    %8 = vector.load %arg14[%c0, %c0_4] : memref<2x32xf32, #tpu.memory_space<vmem>>, vector<2x32xf32>
    %9 = arith.truncf %8 : vector<2x32xf32> to vector<2x32xbf16>
    %c0_5 = arith.constant 0 : index
    %c0_6 = arith.constant 0 : index
    %10 = vector.load %arg9[%c0_5, %c0_6] : memref<32x128xbf16, #tpu.memory_space<vmem>>, vector<32x128xbf16>
    %cst = arith.constant dense<0.000000e+00> : vector<2x128xf32>
    %11 = tpu.matmul %9, %10, %cst {dimension_numbers = #tpu.dot_dimension_numbers<[1], [0], [0], [1], [0, 0, 1, 1], [], []>} : vector<2x32xbf16>, vector<32x128xbf16>, vector<2x128xf32> -> vector<2x128xf32>
    %c0_7 = arith.constant 0 : index
    %c0_8 = arith.constant 0 : index
    %12 = vector.load %arg10[%c0_7, %c0_8] : memref<1x128xf32, #tpu.memory_space<vmem>>, vector<1x128xf32>
    %13 = vector.broadcast %12 : vector<1x128xf32> to vector<2x128xf32>
    %14 = arith.addf %11, %13 : vector<2x128xf32>
    %c0_9 = arith.constant 0 : index
    %c0_10 = arith.constant 0 : index
    %c0_11 = arith.constant 0 : index
    %15 = vector.load %arg12[%c0_9, %c0_10, %c0_11] : memref<1x2x128xf32, #tpu.memory_space<vmem>>, vector<1x2x128xf32>
    %16 = vector.shape_cast %15 : vector<1x2x128xf32> to vector<2x128xf32>
    %17 = vector.shape_cast %14 : vector<2x128xf32> to vector<1x2x128xf32>
    tpu.vector_store %arg12[%c0_9, %c0_10, %c0_11], %17 {strides = array<i32>} : memref<1x2x128xf32, #tpu.memory_space<vmem>>, vector<1x2x128xf32>,
    %18 = tpu.iota {dimensions = array<i32: 1>} : vector<2x128xi32>
    %c128_i32 = arith.constant 128 : i32
    %19 = arith.muli %arg1, %c128_i32 : i32
    %20 = vector.broadcast %19 : i32 to vector<2x128xi32>
    %21 = arith.addi %18, %20 : vector<2x128xi32>
    %cst_12 = arith.constant dense<0xFF800000> : vector<2xf32>
    %22 = vector.multi_reduction <maximumf>, %14, %cst_12 [1] : vector<2x128xf32> to vector<2xf32>
    %23 = vector.shape_cast %22 : vector<2xf32> to vector<2x1xf32>
    %24 = vector.broadcast %23 : vector<2x1xf32> to vector<2x128xf32>
    %25 = arith.cmpf oeq, %14, %24 : vector<2x128xf32>
    %c1073741824_i32 = arith.constant 1073741824 : i32
    %26 = vector.broadcast %c1073741824_i32 : i32 to vector<2x128xi32>
    %27 = arith.select %25, %21, %26 : vector<2x128xi1>, vector<2x128xi32>
    %cst_13 = arith.constant dense<2147483647> : vector<2xi32>
    %28 = vector.multi_reduction <minsi>, %27, %cst_13 [1] : vector<2x128xi32> to vector<2xi32>
    %29 = vector.shape_cast %28 : vector<2xi32> to vector<2x1xi32>
    %c0_14 = arith.constant 0 : index
    %c0_15 = arith.constant 0 : index
    %30 = vector.load %arg15[%c0_14, %c0_15] : memref<2x1xf32, #tpu.memory_space<vmem>>, vector<2x1xf32>
    %31 = arith.cmpf ogt, %23, %30 : vector<2x1xf32>
    %c0_16 = arith.constant 0 : index
    %c0_17 = arith.constant 0 : index
    %32 = vector.load %arg16[%c0_16, %c0_17] : memref<2x1xi32, #tpu.memory_space<vmem>>, vector<2x1xi32>
    %33 = arith.select %31, %29, %32 : vector<2x1xi1>, vector<2x1xi32>
    %c0_18 = arith.constant 0 : index
    %c0_19 = arith.constant 0 : index
    %34 = vector.load %arg16[%c0_18, %c0_19] : memref<2x1xi32, #tpu.memory_space<vmem>>, vector<2x1xi32>
    tpu.vector_store %arg16[%c0_18, %c0_19], %33 {strides = array<i32>} : memref<2x1xi32, #tpu.memory_space<vmem>>, vector<2x1xi32>,
    %c0_20 = arith.constant 0 : index
    %c0_21 = arith.constant 0 : index
    %35 = vector.load %arg15[%c0_20, %c0_21] : memref<2x1xf32, #tpu.memory_space<vmem>>, vector<2x1xf32>
    %36 = arith.select %31, %23, %35 : vector<2x1xi1>, vector<2x1xf32>
    %c0_22 = arith.constant 0 : index
    %c0_23 = arith.constant 0 : index
    %37 = vector.load %arg15[%c0_22, %c0_23] : memref<2x1xf32, #tpu.memory_space<vmem>>, vector<2x1xf32>
    tpu.vector_store %arg15[%c0_22, %c0_23], %36 {strides = array<i32>} : memref<2x1xf32, #tpu.memory_space<vmem>>, vector<2x1xf32>,
    %c0_i32_24 = arith.constant 0 : i32
    %38 = arith.cmpi eq, %arg1, %c0_i32_24 : i32
    %39 = arith.extui %38 : i1 to i32
    %c0_i32_25 = arith.constant 0 : i32
    %40 = arith.cmpi ne, %39, %c0_i32_25 : i32
    scf.if %40 {
      %c0_26 = arith.constant 0 : index
      %c0_27 = arith.constant 0 : index
      %41 = vector.load %arg16[%c0_26, %c0_27] : memref<2x1xi32, #tpu.memory_space<vmem>>, vector<2x1xi32>
      %c0_28 = arith.constant 0 : index
      %c0_29 = arith.constant 0 : index
      %c0_30 = arith.constant 0 : index
      %42 = vector.load %arg13[%c0_28, %c0_29, %c0_30] : memref<1x2x1xi32, #tpu.memory_space<vmem>>, vector<1x2x1xi32>
      %43 = vector.shape_cast %42 : vector<1x2x1xi32> to vector<2x1xi32>
      %44 = vector.shape_cast %41 : vector<2x1xi32> to vector<1x2x1xi32>
      tpu.vector_store %arg13[%c0_28, %c0_29, %c0_30], %44 {strides = array<i32>} : memref<1x2x1xi32, #tpu.memory_space<vmem>>, vector<1x2x1xi32>,
    } else {
    }
    return
  }
  func.func @transform_0(%arg0: i32, %arg1: i32, %arg2: memref<5xi32, #tpu.memory_space<smem>>) -> (i32, i32, i32) {
    %c0_i32 = arith.constant 0 : i32
    %c0_i32_0 = arith.constant 0 : i32
    %c0_i32_1 = arith.constant 0 : i32
    return %arg0, %c0_i32, %c0_i32_0 : i32, i32, i32
  }
  func.func @transform_1(%arg0: i32, %arg1: i32, %arg2: memref<5xi32, #tpu.memory_space<smem>>) -> (i32, i32) {
    %c0_i32 = arith.constant 0 : i32
    %c0_i32_0 = arith.constant 0 : i32
    %c0_i32_1 = arith.constant 0 : i32
    return %c0_i32, %c0_i32_0 : i32, i32
  }
  func.func @transform_2(%arg0: i32, %arg1: i32, %arg2: memref<5xi32, #tpu.memory_space<smem>>) -> (i32, i32) {
    %c0_i32 = arith.constant 0 : i32
    %c0_i32_0 = arith.constant 0 : i32
    %c0_i32_1 = arith.constant 0 : i32
    return %c0_i32, %c0_i32_0 : i32, i32
  }
  func.func @transform_3(%arg0: i32, %arg1: i32, %arg2: memref<5xi32, #tpu.memory_space<smem>>) -> (i32, i32) {
    %c0_i32 = arith.constant 0 : i32
    %c0_i32_0 = arith.constant 0 : i32
    %c0_i32_1 = arith.constant 0 : i32
    return %c0_i32, %c0_i32_0 : i32, i32
  }
  func.func @transform_4(%arg0: i32, %arg1: i32, %arg2: memref<5xi32, #tpu.memory_space<smem>>) -> (i32, i32) {
    %c0_i32 = arith.constant 0 : i32
    %c0_i32_0 = arith.constant 0 : i32
    %c0_i32_1 = arith.constant 0 : i32
    return %c0_i32, %c0_i32_0 : i32, i32
  }
  func.func @transform_5(%arg0: i32, %arg1: i32, %arg2: memref<5xi32, #tpu.memory_space<smem>>) -> (i32, i32) {
    %c0_i32 = arith.constant 0 : i32
    %c0_i32_0 = arith.constant 0 : i32
    %c0_i32_1 = arith.constant 0 : i32
    return %c0_i32, %c0_i32_0 : i32, i32
  }
  func.func @transform_6(%arg0: i32, %arg1: i32, %arg2: memref<5xi32, #tpu.memory_space<smem>>) -> (i32, i32) {
    %c0_i32 = arith.constant 0 : i32
    %c0_i32_0 = arith.constant 0 : i32
    return %c0_i32, %arg1 : i32, i32
  }
  func.func @transform_7(%arg0: i32, %arg1: i32, %arg2: memref<5xi32, #tpu.memory_space<smem>>) -> (i32, i32) {
    %c0_i32 = arith.constant 0 : i32
    %c0_i32_0 = arith.constant 0 : i32
    return %c0_i32, %arg1 : i32, i32
  }
  func.func @transform_8(%arg0: i32, %arg1: i32, %arg2: memref<5xi32, #tpu.memory_space<smem>>) -> (i32, i32) {
    %c0_i32 = arith.constant 0 : i32
    %c0_i32_0 = arith.constant 0 : i32
    %c0_i32_1 = arith.constant 0 : i32
    return %c0_i32, %c0_i32_0 : i32, i32
  }
  func.func @transform_9(%arg0: i32, %arg1: i32, %arg2: memref<5xi32, #tpu.memory_space<smem>>) -> (i32, i32, i32) {
    %c0_i32 = arith.constant 0 : i32
    %c0_i32_0 = arith.constant 0 : i32
    return %arg0, %c0_i32, %arg1 : i32, i32, i32
  }
  func.func @transform_10(%arg0: i32, %arg1: i32, %arg2: memref<5xi32, #tpu.memory_space<smem>>) -> (i32, i32, i32) {
    %c0_i32 = arith.constant 0 : i32
    %c0_i32_0 = arith.constant 0 : i32
    %c0_i32_1 = arith.constant 0 : i32
    return %arg0, %c0_i32, %c0_i32_0 : i32, i32, i32
  }
}

</mosaic_0001>

<bundles_post_ra>
// kernel: decoder_rnn_forward.1
= control target key start
LH: loop header
LB: loop body
LE: loop exit
PB: predicated region body
PF: predicated region fallthrough
CT: control target
= control target key end

     0   :  { %s1583_s0 = inlined_call_operand.vmem [shape: s32[5], index: 0, kind: input, shape index: {}]   ;;  %s1584_s1 = inlined_call_operand.vmem [shape: f32[5,2,64], index: 1, kind: input, shape index: {}]   ;;  %s1585_s2 = inlined_call_operand.vmem [shape: bf16[128,64], index: 2, kind: input, shape index: {}]   ;;  %s1586_s3 = inlined_call_operand.vmem [shape: f32[2,96], index: 3, kind: input, shape index: {}]   ;;  %s1587_s4 = inlined_call_operand.vmem [shape: bf16[64,96], index: 4, kind: input, shape index: {}]   ;;  %s1588_s5 = inlined_call_operand.vmem [shape: bf16[32,96], index: 5, kind: input, shape index: {}]   ;;  %s1589_s6 = inlined_call_operand.vmem [shape: f32[1,96], index: 6, kind: input, shape index: {}]   ;;  %s1590_s7 = inlined_call_operand.vmem [shape: bf16[32,128], index: 7, kind: input, shape index: {}]   ;;  %s1591_s8 = inlined_call_operand.vmem [shape: f32[1,128], index: 8, kind: input, shape index: {}]   ;;  %s1592_s9 = inlined_call_operand.vmem [shape: f32[2,32], index: 9, kind: input, shape index: {}]   ;;  %s1593_s10 = inlined_call_operand.hbm [shape: f32[5,2,128], index: 10, kind: output, shape index: {0}]   ;;  %s1594_s11 = inlined_call_operand.vmem [shape: s32[5,2,1], index: 11, kind: output, shape index: {1}]  }
   0x1   :  { %1597 = sst [smem:[#allocation14_spill]] %s1584_s1  ;;  %s17_s19 = sshll.u32 %s1583_s0, 4  ;;  %s18_s19 = int_to_ptr.vmem [resolvable:$true] %s17_s19 }
   0x2   :  { %s1189_s20 = scalar_lea.vmem %s18_s19, 16  ;;  %p1194_p1 = scmp.lt.s32.totalorder %s18_s19, %s18_s19 }
   0x3   :  { %p1190_p0 = scmp.ne.s32.totalorder %s18_s19, %s1189_s20  ;;  %p1195_p2 = scmp.lt.s32.totalorder %s1189_s20, %s1189_s20 }
   0x5   :  { %p1196_p3 = por %p1195_p2, %p1194_p1 }
   0x7   :  { %p1197_p4 = pnand %p1196_p3, %p1190_p0 }
   0x9   :  { %1200 = shalt.err (!%p1197_p4)  }
   0xa   :  { %s1283_s21 = smov [#allocation6]  }
   0xb   :  { %20 = dma.vmem_to_smem %s18_s19, 16, %s1283_s21, [#allocation5] }
   0xc   :  { %1253 = dma.done.wait [#allocation5], 16 }
   0xd   :  { %1254 = vsyncadd [#allocation5], 4294967280 }
   0xe   :  { %22 = sfence }
   0xf   :  { %23 = vsyncpa [#allocation8], 0 }
  0x10   :  { %25 = vsyncpa [#allocation8 + $0x1], 0  ;;  %s1357_s22 = smov 0   ;;  %s1359_s23 = smov 0  }
  0x11   :  { %s1361_s0 = smov 0   ;;  %s1363_s24 = smov 0  }
  0x12   :  { %s1365_s25 = smov 0   ;;  %s1367_s26 = smov 0  }
  0x13 LB: > { %1598 = sst [smem:[#allocation11_spill]] %s1277_s25  ;;  %s993_s27 = sadd.s32 4294967295, %s1281_s26   ;;  %s1281_s26 = sphi %s1367_s26, %s31_s26   ;;  %s1277_s25 = sphi %s1365_s25, %s1606_s25   ;;  %s1273_s24 = sphi %s1363_s24, %s1605_s24   ;;  %s1269_s0 = sphi %s1361_s0, %s1609_s0   ;;  %s1265_s23 = sphi %s1359_s23, %s1608_s23   ;;  %s1261_s22 = sphi %s1357_s22, %s1607_s22  }
  0x14   : > { %s994_s28 = sadd.s32 4294967294, %s1281_s26   ;;  %s43_s29 = sadd.s32 1, %s1277_s25 }
  0x15   : > { %s256_s30 = sadd.s32 1, %s1269_s0  ;;  %p45_p5 = scmp.ge.s32.totalorder %s43_s29, 5 }
  0x16   : > { %p266_p6 = scmp.ne.s32.totalorder %s1269_s0, %s1265_s23  ;;  %p267_p7 = scmp.eq.s32.totalorder %s993_s27, 4 }
  0x17   : > { %p272_p8 = scmp.ne.s32.totalorder %s1265_s23, %s1261_s22  ;;  %s1611_s29 = smov (%p45_p5, %s43_s29), 0 }
  0x18   : > { %1599 = sst [smem:[#allocation12_spill]] %s1611_s29  ;;  %p1397_p9 = por %p267_p7, %p266_p6 }
  0x19   : > { %p273_p10 = scmp.eq.s32.totalorder %s994_s28, 4  ;;  %s251_s13 = ssub.s32 %s1277_s25, %s1611_s29 }
  0x1a   : > { %p999_p11 = scmp.ge.s32.totalorder %s1281_s26, 1  ;;  %p254_p12 = scmp.eq.s32.totalorder %s251_s13, 0 }
  0x1b   : > { %p1404_p13 = por %p273_p10, %p272_p8  ;;  %p355_p0 = scmp.lt.s32.totalorder %s1281_s26, 6 }
  0x1c   : > { %s1410_s15 = scalar_select %p254_p12, %s1269_s0, %s256_s30  }
  0x1d   : > { %p356_p1 = pnand %p999_p11, %p355_p0 }
  0x1e   : > { %1602 = sst [smem:[#allocation13_spill]] %s1410_s15  ;;  %s394_s16 = sand.u32 (!%p356_p1), 1, %s1265_s23  }
  0x1f   : > { %359 = sbr.rel (%p356_p1) target bundleno = 1772 (0x6ec), region = 56  ;;  %p403_p2 = scmp.lt.s32.totalorder (!%p356_p1), %s1273_s24, 4 }
  0x20   : > { %s1416_s17 = sshll.u32 (!%p356_p1), %s394_s16, 1  ;;  %p419_p3 = scmp.eq.s32.totalorder (!%p356_p1), %s1273_s24, 0 }
  0x21   : > { %s1603_s1 = sld [smem:[#allocation14_spill]] (!%p356_p1)  ;;  %s396_s29 = scalar_lea.vmem (!%p356_p1), [#allocation7], %s1416_s17 }
  0x26   : > { %s404_s18 = scalar_select %p403_p2, %s1273_s24, 4 }
  0x27   : > { %424 = sbr.rel (!%p419_p3) target bundleno = 46 (0x2e), region = 60  ;;  %v425_v0 = vld [vmem:[%s1592_s9] sm:$0x3] (%p419_p3)  ;;  %vm426_vm0 = vcmask (%p419_p3), 254976   ;;  %vm428_vm1 = vcmask (%p419_p3), 1024   ;;  %v1284_v1 = vmov (%p419_p3), 1  }
  0x28   : > { %s1001_s19 = sshll.u32 %s404_s18, 1  ;;  %427 = vst.msk [vmem:[#allocation2] sm:$0x3] (%p419_p3), %vm426_vm0, %v425_v0 }
  0x29   : > { %s1423_s27 = scalar_lea.vmem %s1603_s1, %s1001_s19  ;;  %s1428_s13 = scalar_lea.vmem %s1594_s11, %s1001_s19  ;;  %429 = vst.msk [vmem:[#allocation4] sm:$0x3] (%p419_p3), %vm428_vm1, %v1284_v1 }
  0x2e PF: > { %v1285_v3 = vmov 0   ;;  %v1286_v4 = vmov 0.0   ;;  %v1167_v5 = vld [vmem:[%s1585_s2] sm:$0xff]   ;;  %v1168_v6 = vld [vmem:[%s1585_s2 + $0x8] sm:$0xff]   ;;  %vm1287_vm2 = vmmov 0   ;;  %v1169_v7 = vld [vmem:[%s1585_s2 + $0x10] sm:$0xff]   ;;  %v438_v16 = vlaneseq }
  0x2f   : > { %1166 = vset.pattern.permute.xlu0 %v1285_v3  ;;  %1053 = vmatprep.subr.bf16.mxu0 %v1286_v4  ;;  %v1175_v8 = vld [vmem:[%s1587_s4] sm:$0xff]   ;;  %v1176_v9 = vld [vmem:[%s1587_s4 + $0x8] sm:$0xff]   ;;  %v1170_v10 = vld [vmem:[%s1585_s2 + $0x18] sm:$0xff]   ;;  %v1288_v19 = vmov 1.0|1.0   ;;  %s433_s18 = sld [smem:[#allocation6 + %s1273_s24]] }
  0x30   : > { %v440_v2 = vld [vmem:[#allocation4] sm:$0x3]  ;;  %1073 = vmatprep.subr.bf16.mxu1 %v1286_v4  ;;  %1054 = vmatpush3.bf16.msra.mxu0 %v1167_v5  ;;  %v1177_v11 = vld [vmem:[%s1587_s4 + $0x10] sm:$0xff]   ;;  %v1172_v13 = vld [vmem:[%s1585_s2 + $0x28] sm:$0xff]   ;;  %v1483_v17 = vand.u32 127, %v438_v16  ;;  %vm592_vm5 = vcmask 523264  }
  0x31   : > { %442 = vperm.xlu0 %1166, %v440_v2   ;;  %1055 = vmatprep.subr.bf16.mxu0 %v1286_v4  ;;  %v1171_v12 = vld [vmem:[%s1585_s2 + $0x20] sm:$0xff]   ;;  %v1173_v14 = vld [vmem:[%s1585_s2 + $0x30] sm:$0xff]   ;;  %v1174_v15 = vld [vmem:[%s1585_s2 + $0x38] sm:$0xff]   ;;  %vm660_vm6 = vcmask 261120   ;;  %s1291_s21 = smov 96   ;;  %vm738_vm7 = vcmask 254976  }
  0x32   : > { %1069 = vmatprep.mubr.msk.bf16.mxu0 %vm1287_vm2, %v1286_v4  ;;  %1081 = vmatprep.mubr.msk.bf16.mxu1 %vm1287_vm2, %v1286_v4  ;;  %v1178_v20 = vld [vmem:[%s1587_s4 + $0x18] sm:$0xff]   ;;  %v437_v21 = vld [vmem:[%s1423_s27] sm:$0x3]  ;;  %v1180_v33 = vld [vmem:[%s1588_s5 + $0x8] sm:$0xff]   ;;  %vm740_vm8 = vcmask 1024   ;;  %vm817_vm9 = vcmask 1041408  }
  0x33   : > { %1074 = vmatpush3.bf16.msra.mxu1 %v1175_v8  ;;  %v1179_v31 = vld [vmem:[%s1588_s5] sm:$0xff]   ;;  %v1182_v59 = vld [vmem:[%s1590_s7 + $0x8] sm:$0xff]   ;;  %s871_s20 = sshll.u32 %s396_s29, 4  ;;  %s853_s27 = scalar_lea.sflag [#allocation8], %s394_s16  ;;  %s872_s20 = int_to_ptr.vmem [resolvable:$true] %s871_s20 }
  0x34   : > { %1056 = vmatpush3.bf16.msra.mxu0 %v1168_v6  ;;  %1075 = vmatprep.subr.bf16.mxu1 %v1286_v4  ;;  %v557_v34 = vld [vmem:[#allocation2] sm:$0x3]  ;;  %v1292_v6 = vmov -inf  }
  0x35   : > { %1057 = vmatprep.subr.bf16.mxu0 %v1286_v4  ;;  %p434_p4 = scmp.gt.s32.totalorder %s433_s18, 0  ;;  %v636_v35 = vpack.c.bf16 %v557_v34, %v557_v34  ;;  %v1019_v40 = vld [vmem:[%s1589_s6] ss:$0 sm:$0xff]  ;;  %741 = vst.msk [vmem:[#allocation3] sm:$0x3] %vm740_vm8, %v1292_v6  ;;  %s1201_s18 = scalar_lea.vmem %s872_s20, 32 }
  0x36   : > { %v567_v46 = vld [vmem:[%s1586_s3] sm:$0x3]  ;;  %p1202_p5 = scmp.ne.s32.totalorder %s872_s20, %s1201_s18 }
  0x37   : > { %1076 = vmatpush3.bf16.msra.mxu1 %v1176_v9  ;;  %s435_s19 = scalar_select %p434_p4, 1, 0  ;;  %v1181_v58 = vld [vmem:[%s1590_s7] sm:$0xff]  }
  0x38   : > { %1058 = vmatpush3.bf16.msra.mxu0 %v1169_v7  ;;  %1077 = vmatprep.subr.bf16.mxu1 %v1286_v4  ;;  %p1203_p6 = pnand %p1202_p5, %p1397_p9 }
  0x39   : > { %1059 = vmatprep.subr.bf16.mxu0 %v1286_v4  ;;  %s436_s25 = scvt.s32.f32 %s435_s19  ;;  %s1289_s19 = smov 64  }
  0x3a   : > { %p1204_p7 = pneg %p1203_p6 }
  0x3b   : > { %1078 = vmatpush3.bf16.msra.mxu1 %v1177_v11  ;;  %s553_s15 = ssub.f32 1.0, %s436_s25  ;;  %v551_v22 = vstv %s436_s25  ;;  %s1290_s25 = smov 32  }
  0x3c   : > { %1060 = vmatpush3.bf16.msra.mxu0 %v1170_v10  ;;  %1079 = vmatprep.subr.bf16.mxu1 %v1286_v4  ;;  %v552_v24 = vmul.f32 %v551_v22, %v437_v21 }
  0x3d   : > { %1061 = vmatprep.subr.bf16.mxu0 %v1286_v4  ;;  %v554_v23 = vstv %s553_s15  ;;  %s1029_s15 = sshll.u32 %s1273_s24, 5 }
  0x3e   : > { %s1536_s30 = scalar_lea.hbm %s1593_s10, %s1029_s15 }
  0x3f   : > { %1080 = vmatpush3.bf16.msra.mxu1 %v1178_v20 }
  0x40   : > { %1062 = vmatpush3.bf16.msra.mxu0 %v1171_v12  ;;  %1085 = vmatprep.subr.bf16.mxu1 %v1286_v4 }
  0x41   : > { %1063 = vmatprep.subr.bf16.mxu0 %v1286_v4 }
  0x44   : > { %1064 = vmatpush3.bf16.msra.mxu0 %v1172_v13  ;;  %v838_v13 = vld [vmem:[#allocation3] sm:$0x3] }
  0x45   : > { %1065 = vmatprep.subr.bf16.mxu0 %v1286_v4 }
  0x48   : > { %1066 = vmatpush3.bf16.msra.mxu0 %v1173_v14  ;;  %v844_v14 = vld [vmem:[#allocation3] sm:$0x3] }
  0x49   : > { %1067 = vmatprep.subr.bf16.mxu0 %v1286_v4 }
  0x4c   : > { %1068 = vmatpush3.bf16.msra.mxu0 %v1174_v15 }
  0xb0   : > { %v443_v18 = vpop.permute.xlu0 %442 }
  0xb1   : > { %vm444_vm3 = vcmp.eq.s32.totalorder %v1483_v17, %v443_v18 }
  0xb2   : > { %vm1012_vm4 = vmpackc.low %vm444_vm3, %vm444_vm3 }
  0xb3   : > { %1070 = vmatmul.mubr.msk.bf16.vlgmr.msra.gmra.mrb[0].mxu0 %vm1012_vm4, %v1288_v19 }
 0x186   : > { %v545_v25 = vpop.f32.mrb[0].mxu0 }
 0x187   : > { %v555_v26 = vmul.f32 %v554_v23, %v545_v25  ;;  %v1071_v27 = vpop.f32.mrb[1].mxu0 }
 0x188   : > { %v548_v28 = vpop.f32.mrb[2].mxu0 }
 0x189   : > { %v556_v29 = vadd.f32 %v555_v26, %v552_v24  ;;  %v1072_v30 = vpop.f32.mrb[3].mxu0 }
 0x18b   : > { %v558_v32 = vpack.c.bf16 %v556_v29, %v556_v29 }
 0x18d   : > { %1082 = vmatmul.mubr.msk.bf16.vlgmr.msra.gmra.mrb[0].mxu1 %vm592_vm5, %v558_v32 }
 0x18e   : > { %1086 = vmatpush3.bf16.msra.mxu1 %v1179_v31  ;;  %1089 = vmatprep.mubr.msk.bf16.mxu1 %vm1287_vm2, %v1286_v4 }
 0x18f   : > { %1087 = vmatprep.subr.bf16.mxu1 %v1286_v4 }
 0x192   : > { %1088 = vmatpush3.bf16.msra.mxu1 %v1180_v33 }
 0x193   : > { %1093 = vmatprep.subr.bf16.mxu1 %v1286_v4 }
 0x195   : > { %1090 = vmatmul.mubr.msk.bf16.vlgmr.msra.gmra.mrb[4].mxu1 %vm660_vm6, %v636_v35 }
 0x196   : > { %1097 = vmatprep.mubr.msk.bf16.mxu1 %vm1287_vm2, %v1286_v4  ;;  %1094 = vmatpush3.bf16.msra.mxu1 %v1181_v58 }
 0x197   : > { %1095 = vmatprep.subr.bf16.mxu1 %v1286_v4  ;;  %v1024_v4 = vld [vmem:[%s1591_s8] ss:$0 sm:$0xff] }
 0x19a   : > { %1096 = vmatpush3.bf16.msra.mxu1 %v1182_v59 }
 0x260   : > { %v630_v36 = vpop.f32.mrb[0].mxu1 }
 0x261   : > { %v1083_v37 = vpop.f32.mrb[1].mxu1  ;;  %v631_v47 = vadd.f32 %v630_v36, %v567_v46 }
 0x262   : > { %v633_v38 = vpop.f32.mrb[2].mxu1 }
 0x263   : > { %v1084_v39 = vpop.f32.mrb[3].mxu1 }
 0x268   : > { %v698_v41 = vpop.f32.mrb[4].mxu1 }
 0x269   : > { %v699_v42 = vadd.f32 %v1019_v40, %v698_v41  ;;  %v1091_v43 = vpop.f32.mrb[5].mxu1 }
 0x26a   : > { %v701_v44 = vpop.f32.mrb[6].mxu1 }
 0x26b   : > { %712 = vrot.lane.b32.xlu0 %v699_v42, %s1289_s19  ;;  %v1092_v45 = vpop.f32.mrb[7].mxu1  ;;  %v704_v48 = vadd.f32 %v699_v42, %v631_v47 }
 0x26d   : > { %v1023_v49 = vmul.f32 -1.442695, %v704_v48 }
 0x26f   : > { %729 = vrot.lane.b32.xlu0 %v557_v34, %s1290_s25  ;;  %1183 = vpow2.f32 %v1023_v49 }
 0x279   : > { %v1184_v50 = vpop.eup %1183 }
 0x27a   : > { %v708_v51 = vadd.f32 1.0, %v1184_v50 }
 0x27c   : > { %1185 = vrcp.f32 %v708_v51 }
 0x286   : > { %v1186_v52 = vpop.eup %1185 }
 0x287   : > { %v722_v61 = vsub.f32 1.0, %v1186_v52 }
 0x2dd   : > { %v713_v53 = vpop.permute.xlu0 %712 }
 0x2de   : > { %v715_v54 = vmul.f32 %v1186_v52, %v713_v53 }
 0x2e0   : > { %717 = vrot.lane.b32.xlu1 %v715_v54, %s1289_s19  ;;  %s1293_s19 = smov [#allocation7]  }
 0x2e1   : > { %v730_v60 = vpop.permute.xlu0 %729  ;;  %s1205_s25 = sshll.u32 %s1293_s19, 4  ;;  %s1206_s25 = int_to_ptr.vmem [resolvable:$false] %s1205_s25 }
 0x2e2   : > { %v732_v63 = vmul.f32 %v1186_v52, %v730_v60  ;;  %s1207_s1 = scalar_lea.vmem %s1206_s25, 64  ;;  %p1208_p8 = scmp.lt.s32.totalorder %s872_s20, %s1206_s25 }
 0x2e3   : > { %p1209_p10 = scmp.lt.s32.totalorder %s1207_s1, %s1201_s18 }
 0x2e5   : > { %p1210_p11 = por %p1209_p10, %p1208_p8 }
 0x2e7   : > { %p1211_p12 = pnand %p1210_p11, %p1204_p7 }
 0x352   : > { %v718_v55 = vpop.permute.xlu1 %717 }
 0x353   : > { %v720_v56 = vadd.f32 %v718_v55, %v631_v47 }
 0x355   : > { %1187 = vtanh.f32 %v720_v56 }
 0x35f   : > { %v1188_v57 = vpop.eup %1187 }
 0x360   : > { %724 = vrot.lane.b32.xlu1 %v1188_v57, %s1291_s21 }
 0x3d2   : > { %v725_v62 = vpop.permute.xlu1 %724 }
 0x3d3   : > { %v727_v0 = vmul.f32 %v725_v62, %v722_v61 }
 0x3d5   : > { %v733_v1 = vadd.f32 %v732_v63, %v727_v0 }
 0x3d7   : > { %735 = vrot.lane.b32.xlu1 %v733_v1, %s1291_s21 }
 0x449   : > { %v736_v2 = vpop.permute.xlu1 %735 }
 0x44a   : > { %739 = vst.msk [vmem:[#allocation2] sm:$0x3] %vm738_vm7, %v736_v2 }
 0x451   : > { %v742_v3 = vld [vmem:[#allocation2] sm:$0x3] }
 0x452   : > { %v743_v5 = vpack.c.bf16 %v742_v3, %v742_v3 }
 0x454   : > { %1098 = vmatmul.mubr.msk.bf16.vlgmr.msra.gmra.mrb[8].mxu1 %vm660_vm6, %v743_v5 }
 0x527   : > { %v805_v7 = vpop.f32.mrb[8].mxu1 }
 0x528   : > { %v806_v8 = vadd.f32 %v1024_v4, %v805_v7  ;;  %v1099_v9 = vpop.f32.mrb[9].mxu1 }
 0x529   : > { %v808_v10 = vpop.f32.mrb[10].mxu1 }
 0x52a   : > { %811 = vst [vmem:[%s396_s29] sm:$0x3] %v806_v8  ;;  %v1100_v11 = vpop.f32.mrb[11].mxu1  ;;  %v818_v12 = vsel %vm817_vm9, %v806_v8, -inf }
 0x52b   : > { %819 = vmax.xlane.f32.xlu0 %v818_v12 }
 0x5b8   : > { %v820_v15 = vpop.xlane.xlu0 %819 }
 0x5b9   : > { %vm821_vm10 = vcmp.eq.f32.partialorder %v806_v8, %v820_v15  ;;  %vm839_vm11 = vcmp.gt.f32.partialorder %v820_v15, %v838_v13 }
 0x5ba   : > { %v845_v16 = vsel %vm839_vm11, %v820_v15, %v844_v14  ;;  %v822_v18 = vsel %vm821_vm10, %v1483_v17, 1073741824 }
 0x5bb   : > { %846 = vst.msk [vmem:[#allocation3] sm:$0x3] %vm740_vm8, %v845_v16  ;;  %v823_v19 = vsel %vm817_vm9, %v822_v18, 2147483647 }
 0x5bc   : > { %v825_v20 = vshra.s32 %v823_v19, 16  ;;  %v824_v22 = vand.u32 65535, %v823_v19 }
 0x5be   : > { %v827_v21 = vcvt.s32.f32 %v825_v20  ;;  %v826_v24 = vcvt.s32.f32 %v824_v22 }
 0x5c0   : > { %828 = vmin.xlane.f32.xlu1 %v827_v21 }
 0x64d   : > { %v829_v23 = vpop.xlane.xlu1 %828 }
 0x64e   : > { %vm830_vm12 = vcmp.eq.f32.partialorder %v827_v21, %v829_v23 }
 0x64f   : > { %v831_v25 = vsel %vm830_vm12, %v826_v24, inf }
 0x650   : > { %832 = vmin.xlane.f32.xlu0 %v831_v25 }
 0x651   : > { %1214 = shalt.err (!%p1211_p12)
}
 0x652   : > { %s1215_s24 = scalar_lea.hbm %s1536_s30, 32  ;;  %s1219_s17 = scalar_lea.hbm %s1593_s10, 160 }
 0x653   : > { %p1216_p0 = scmp.ne.s32.totalorder %s1536_s30, %s1215_s24  ;;  %p1220_p3 = scmp.lt.u32.totalorder %s1536_s30, %s1593_s10 }
 0x654   : > { %p1221_p4 = scmp.lt.u32.totalorder %s1219_s17, %s1215_s24  ;;  %p1223_p6 = scmp.lt.u32.totalorder %s1215_s24, %s1536_s30 }
 0x655   : > { %p1217_p1 = pnand %p1216_p0, %p1397_p9 }
 0x656   : > { %p1222_p5 = por %p1221_p4, %p1220_p3 }
 0x657   : > { %p1218_p2 = pneg %p1217_p1 }
 0x658   : > { %p1224_p7 = por %p1223_p6, %p1222_p5 }
 0x65a   : > { %p1225_p8 = pnand %p1224_p7, %p1218_p2 }
 0x65c   : > { %1228 = shalt.err (!%p1225_p8)
}
 0x65d   : > { %1101 = dma.vmem_to_hbm [thread:$0]  (%p1397_p9), %s872_s20, 32, %s1536_s30, %s853_s27   ;;  %v835_v17 = vcvt.f32.s32 %v829_v23  ;;  %v840_v29 = vld [vmem:[#allocation4] sm:$0x3] }
 0x65f   : > { %v836_v27 = vshll.u32 %v835_v17, 16 }
 0x6dd   : > { %v833_v26 = vpop.xlane.xlu0 %832 }
 0x6de   : > { %v834_v28 = vcvt.f32.s32 %v833_v26 }
 0x6e0   : > { %v837_v30 = vadd.s32 %v836_v27, %v834_v28 }
 0x6e2   : > { %v841_v31 = vsel %vm839_vm11, %v837_v30, %v840_v29 }
 0x6e3   : > { %843 = vst.msk [vmem:[#allocation4] sm:$0x3] %vm740_vm8, %v841_v31 }
 0x6ea   : > { %v850_v32 = vld [vmem:[#allocation4] sm:$0x3] }
 0x6eb   : > { %851 = vst.msk [vmem:[%s1428_s13] sm:$0x3] %vm740_vm8, %v850_v32 }
 0x6ec PF: > { %p1107_p10 = scmp.ge.s32.totalorder %s1281_s26, 2  ;;  %s886_s1 = sand.u32 1, %s1261_s22  }
 0x6ed   : > { %s887_s12 = scalar_lea.sflag [#allocation8], %s886_s1 }
 0x6ee   : > { %p1104_p9 = pnand %p1107_p10, %p1404_p13 }
 0x6f0   : > { %1256 = dma.done.wait (!%p1104_p9), %s887_s12, 32  }
 0x6f1   : > { %1258 = vsyncadd (!%p1104_p9), %s887_s12, 4294967264  ;;  %s31_s26 = sadd.s32 1, %s1281_s26   ;;  %s1604_s20 = sld [smem:[#allocation13_spill]] }
 0x6f2   : > { %p28_p11 = scmp.ge.s32.totalorder %s31_s26, 7   ;;  %s1605_s24 = sld [smem:[#allocation11_spill]] }
 0x6f3   : > { %s1606_s25 = sld [smem:[#allocation12_spill]]  ;;  %s1607_s22 = smov %s1265_s23 }
 0x6f4   : > { %s1608_s23 = smov %s1269_s0  ;;  %30 = sbr.rel (!%p28_p11) target bundleno = 19 (0x13), region = 121 }
 0x6f7   : > { %s1609_s0 = smov %s1604_s20 }
 0x6fb   :  { %899 = vsyncpa [#allocation8], 1 }
 0x6fc   :  { %901 = vsyncpa [#allocation8 + $0x1], 1 }

</bundles_post_ra>
